<compile_context>
chip_gen: v6e
topology: v6e:2x2x1
jax: 0.10.0
libtpu: 0.0.40
codegen_flags: <defaults>
</compile_context>

<pallas_src>
import jax
import jax.numpy as jnp
from jax.experimental import pallas as pl
from jax.experimental.pallas import tpu as pltpu

# --- model dimensions (from the PyTorch module) ---
N_STATE, H1, H2, N_ACTIONS, H3 = 4, 25, 50, 2, 25
LANES = 128
IN_LANES = 8          # states padded 4 -> 8 (one f32 sublane tile of contraction)
OUT_LANES = 8         # output slab: lanes 0-1 actor, lane 2 critic, 3-7 zero pad
CRITIC_LANE = 2       # critic value routed here via weight packing
H3_OFF = 8            # h3 pre-activation occupies lanes [8, 8+H3) of the fused head


def _round_up(a, m):
    return ((a + m - 1) // m) * m


def _forward_math(x8, w1, wp, bp):
    """Shared math for the Pallas kernel body and the plain-XLA small-batch fallback.

    x8: (M, 8)  f32   states, lanes >= 4 zero
    w1: (8, 128) f32  layer-1 weight (rows >= 4 / cols >= 25 zero)
    wp: (3, 128, 128) bf16  [w2 | fused(actor, l3) | critic routing]
    bp: (8, 128) f32  bias rows [b1 | b2 | fused(ba, b3) | bc | 0...]
    returns (M, 8) f32 output slab.
    """
    # F.normalize along the feature dim (per row); rsqrt = single EUP op.
    ss = jnp.sum(x8 * x8, axis=-1, keepdims=True)
    xn = x8 * jax.lax.rsqrt(jnp.maximum(ss, 1e-24))   # zero rows stay exactly zero

    # l1 -> relu  (tiny contraction of 8, kept f32)
    h1 = jnp.maximum(
        jnp.dot(xn, w1, preferred_element_type=jnp.float32) + bp[0:1, :], 0.0)
    # l2 -> relu  (bf16 operands, f32 accumulate)
    h2 = jnp.maximum(
        jnp.dot(h1.astype(jnp.bfloat16), wp[0],
                preferred_element_type=jnp.float32) + bp[1:2, :], 0.0)

    # Fused heads: one dot gives actor logits (lanes 0-1) and h3 pre-act (lanes 8-32).
    heads = (jnp.dot(h2.astype(jnp.bfloat16), wp[1],
                     preferred_element_type=jnp.float32) + bp[2:3, :])

    # Actor: log_softmax over the N_ACTIONS real lanes only (per row, f32).
    lane = jax.lax.broadcasted_iota(jnp.int32, heads.shape, 1)
    a_valid = lane < N_ACTIONS
    masked = jnp.where(a_valid, heads, jnp.float32(-1e30))   # sentinel must stay f32
    lmax = jnp.max(masked, axis=-1, keepdims=True)
    lse = lmax + jnp.log(jnp.sum(jnp.exp(masked - lmax), axis=-1, keepdims=True))
    actor = jnp.where(a_valid, heads - lse, 0.0)

    # Critic (detach() is a forward no-op): relu the whole fused slab -- the critic
    # routing weight has zero rows everywhere except lanes [8, 33), so relu'd logits
    # contribute nothing -- then tanh.  Result lands in lane CRITIC_LANE only.
    h3 = jnp.maximum(heads, 0.0)
    critic = jnp.tanh(
        jnp.dot(h3.astype(jnp.bfloat16), wp[2],
                preferred_element_type=jnp.float32) + bp[3:4, :])

    out = actor + critic                       # lanes 0-1 actor, lane 2 critic, rest 0
    return out[:, :OUT_LANES]


def _actor_critic_kernel(x_ref, w1_ref, wp_ref, bp_ref, out_ref):
    out_ref[...] = _forward_math(x_ref[...], w1_ref[...], wp_ref[...], bp_ref[...])


def actor_critic_forward(x, params, *, tm=None, min_kernel_batch=128):
    """x: (B, 4) batch of states or a single (4,) state. Returns (actor, critic)."""
    single = (x.ndim == 1)
    x2 = (x[None, :] if single else x).astype(jnp.float32)
    B = x2.shape[0]

    if B < min_kernel_batch:
        # Tiny batch / single state: plain XLA is strictly cheaper than padding up
        # to a full kernel tile.  Identical math, identical packed params.
        x8 = jnp.zeros((B, IN_LANES), jnp.float32).at[:, :N_STATE].set(x2)
        out = _forward_math(x8, params["w1"], params["w_packed"], params["b_packed"])
    else:
        if tm is None:
            # >= 2 grid steps whenever possible (occupies both v7x TensorCores),
            # capped at 1024 rows/step (ample VMEM headroom even on v5e's 16 MiB scope).
            tm = min(1024, max(128, _round_up(pl.cdiv(B, 2), 128)))
        n_tiles = pl.cdiv(B, tm)
        Bp = n_tiles * tm
        # Pad batch to a tile multiple and features to 8 lanes (zero rows normalize
        # to zero and are sliced away; zero lanes don't change the norm).
        x8 = jnp.zeros((Bp, IN_LANES), jnp.float32).at[:B, :N_STATE].set(x2)

        out = pl.pallas_call(
            _actor_critic_kernel,
            out_shape=jax.ShapeDtypeStruct((Bp, OUT_LANES), jnp.float32),
            grid=(n_tiles,),
            in_specs=[
                pl.BlockSpec((tm, IN_LANES), lambda i: (i, 0)),        # states
                pl.BlockSpec((IN_LANES, LANES), lambda i: (0, 0)),     # w1 (resident)
                pl.BlockSpec((3, LANES, LANES), lambda i: (0, 0, 0)),  # packed W (resident)
                pl.BlockSpec((8, LANES), lambda i: (0, 0)),            # packed b (resident)
            ],
            out_specs=pl.BlockSpec((tm, OUT_LANES), lambda i: (i, 0)),
            compiler_params=pltpu.CompilerParams(dimension_semantics=("parallel",)),
        )(x8, params["w1"], params["w_packed"], params["b_packed"])

    actor = out[:B, :N_ACTIONS]
    critic = out[:B, CRITIC_LANE:CRITIC_LANE + 1]
    if single:
        actor, critic = actor[0], critic[0]
    return actor, critic


def init_raw_params(key):
    """Synthetic params with nn.Linear's default init, stored as (in, out) / (out,)."""
    ks = jax.random.split(key, 10)

    def lin(kw, kb, n_in, n_out):
        bound = 1.0 / jnp.sqrt(n_in)
        w = jax.random.uniform(kw, (n_in, n_out), jnp.float32, -bound, bound)
        b = jax.random.uniform(kb, (n_out,), jnp.float32, -bound, bound)
        return w, b

    w1, b1 = lin(ks[0], ks[1], N_STATE, H1)
    w2, b2 = lin(ks[2], ks[3], H1, H2)
    wa, ba = lin(ks[4], ks[5], H2, N_ACTIONS)
    w3, b3 = lin(ks[6], ks[7], H2, H3)
    wc, bc = lin(ks[8], ks[9], H3, 1)
    return dict(w1=w1, b1=b1, w2=w2, b2=b2, wa=wa, ba=ba, w3=w3, b3=b3, wc=wc, bc=bc)


def pack_params(raw):
    """Pad/pack the five layers into one small f32 w1, one bf16 weight slab, one f32 bias slab."""
    bf = jnp.bfloat16
    # Layer 1: tiny, stays f32; contraction dim padded to 8.
    w1 = jnp.zeros((IN_LANES, LANES), jnp.float32).at[:N_STATE, :H1].set(raw["w1"])

    wp = jnp.zeros((3, LANES, LANES), bf)
    # slice 0: l2 (25 -> 50)
    wp = wp.at[0, :H1, :H2].set(raw["w2"].astype(bf))
    # slice 1: fused heads -- actor logits in cols 0-1, l3 (h3 pre-act) in cols 8-32
    wp = wp.at[1, :H2, :N_ACTIONS].set(raw["wa"].astype(bf))
    wp = wp.at[1, :H2, H3_OFF:H3_OFF + H3].set(raw["w3"].astype(bf))
    # slice 2: critic routing -- rows 8-32 (h3 lanes) -> output lane CRITIC_LANE
    wp = wp.at[2, H3_OFF:H3_OFF + H3, CRITIC_LANE].set(raw["wc"][:, 0].astype(bf))

    bp = jnp.zeros((8, LANES), jnp.float32)
    bp = bp.at[0, :H1].set(raw["b1"])
    bp = bp.at[1, :H2].set(raw["b2"])
    bp = bp.at[2, :N_ACTIONS].set(raw["ba"])
    bp = bp.at[2, H3_OFF:H3_OFF + H3].set(raw["b3"])
    bp = bp.at[3, CRITIC_LANE].set(raw["bc"][0])
    return dict(w1=w1, w_packed=wp, b_packed=bp)


def reference_forward(x, raw):
    """Pure-JAX f32 HIGHEST-precision reference replicating the PyTorch forward, row-wise."""
    hp = jax.lax.Precision.HIGHEST
    x = jnp.atleast_2d(x).astype(jnp.float32)
    xn = x / jnp.maximum(jnp.linalg.norm(x, axis=-1, keepdims=True), 1e-12)
    h1 = jax.nn.relu(jnp.dot(xn, raw["w1"], precision=hp) + raw["b1"])
    h2 = jax.nn.relu(jnp.dot(h1, raw["w2"], precision=hp) + raw["b2"])
    actor = jax.nn.log_softmax(jnp.dot(h2, raw["wa"], precision=hp) + raw["ba"], axis=-1)
    h3 = jax.nn.relu(jnp.dot(h2, raw["w3"], precision=hp) + raw["b3"])
    critic = jnp.tanh(jnp.dot(h3, raw["wc"], precision=hp) + raw["bc"])
    return actor, critic


if __name__ == "__main__":
    key = jax.random.PRNGKey(0)
    k_x, k_p = jax.random.split(key)

    B = 256                                      # auto tile -> tm=128, 2 parallel grid steps
    x = jax.random.normal(k_x, (B, N_STATE), jnp.float32)
    raw = init_raw_params(k_p)
    params = pack_params(raw)

    actor, critic = actor_critic_forward(x, params)
    jax.block_until_ready((actor, critic))

    a_ref, c_ref = reference_forward(x, raw)
    assert actor.shape == (B, N_ACTIONS) and critic.shape == (B, 1)
    # 3e-2 tolerance absorbs bf16 matmul operands vs the f32 HIGHEST reference; any
    # semantic bug (wrong lane routing / mixed rows) produces errors of order 1.
    assert jnp.allclose(actor, a_ref, atol=3e-2, rtol=3e-2)
    assert jnp.allclose(critic, c_ref, atol=3e-2, rtol=3e-2)

    # Single-state path (matches the original 1-D PyTorch forward; plain-XLA fallback).
    a1, c1 = actor_critic_forward(x[0], params)
    jax.block_until_ready((a1, c1))
    assert a1.shape == (N_ACTIONS,) and c1.shape == (1,)
    assert jnp.allclose(a1, a_ref[0], atol=3e-2, rtol=3e-2)
    assert jnp.allclose(c1, c_ref[0], atol=3e-2, rtol=3e-2)

    print("KERNEL_OK")
</pallas_src>

<mosaic_0001>
module attributes {stable_mosaic.version = 11 : i64} {
  func.func @_actor_critic_kernel(%arg0: i32, %arg1: memref<128x8xf32, #tpu.memory_space<vmem>>, %arg2: memref<8x128xf32, #tpu.memory_space<vmem>>, %arg3: memref<3x128x128xbf16, #tpu.memory_space<vmem>>, %arg4: memref<8x128xf32, #tpu.memory_space<vmem>>, %arg5: memref<128x8xf32, #tpu.memory_space<vmem>>) attributes {dimension_semantics = [#tpu.dimension_semantics<parallel>], iteration_bounds = array<i64: 2>, scalar_prefetch = 0 : i64, scratch_operands = 0 : i64, tpu.core_type = #tpu.core_type<tc>, window_params = [{transform_indices = @transform_0, window_bounds = array<i64: 128, 8>}, {pipeline_mode = #tpu.pipeline_mode<synchronous>, transform_indices = @transform_1, window_bounds = array<i64: 8, 128>}, {pipeline_mode = #tpu.pipeline_mode<synchronous>, transform_indices = @transform_2, window_bounds = array<i64: 3, 128, 128>}, {pipeline_mode = #tpu.pipeline_mode<synchronous>, transform_indices = @transform_3, window_bounds = array<i64: 8, 128>}, {transform_indices = @transform_4, window_bounds = array<i64: 128, 8>}]} {
    %c0 = arith.constant 0 : index
    %c0_0 = arith.constant 0 : index
    %0 = vector.load %arg1[%c0, %c0_0] : memref<128x8xf32, #tpu.memory_space<vmem>>, vector<128x8xf32>
    %c0_1 = arith.constant 0 : index
    %c0_2 = arith.constant 0 : index
    %1 = vector.load %arg2[%c0_1, %c0_2] : memref<8x128xf32, #tpu.memory_space<vmem>>, vector<8x128xf32>
    %c0_3 = arith.constant 0 : index
    %c0_4 = arith.constant 0 : index
    %c0_5 = arith.constant 0 : index
    %2 = vector.load %arg3[%c0_3, %c0_4, %c0_5] : memref<3x128x128xbf16, #tpu.memory_space<vmem>>, vector<3x128x128xbf16>
    %c0_6 = arith.constant 0 : index
    %c0_7 = arith.constant 0 : index
    %3 = vector.load %arg4[%c0_6, %c0_7] : memref<8x128xf32, #tpu.memory_space<vmem>>, vector<8x128xf32>
    %4 = arith.mulf %0, %0 : vector<128x8xf32>
    %cst = arith.constant dense<0.000000e+00> : vector<128xf32>
    %5 = vector.multi_reduction <add>, %4, %cst [1] : vector<128x8xf32> to vector<128xf32>
    %6 = vector.shape_cast %5 : vector<128xf32> to vector<128x1xf32>
    %cst_8 = arith.constant 1.000000e-24 : f32
    %7 = vector.broadcast %cst_8 : f32 to vector<128x1xf32>
    %8 = arith.maximumf %6, %7 : vector<128x1xf32>
    %9 = math.rsqrt %8 : vector<128x1xf32>
    %10 = vector.broadcast %9 : vector<128x1xf32> to vector<128x8xf32>
    %11 = arith.mulf %0, %10 : vector<128x8xf32>
    %cst_9 = arith.constant dense<0.000000e+00> : vector<128x128xf32>
    %12 = tpu.matmul %11, %1, %cst_9 {dimension_numbers = #tpu.dot_dimension_numbers<[1], [0], [0], [1], [0, 0, 1, 1], [], []>} : vector<128x8xf32>, vector<8x128xf32>, vector<128x128xf32> -> vector<128x128xf32>
    %13 = vector.extract_strided_slice %3 {offsets = [0, 0], sizes = [1, 128], strides = [1, 1]} : vector<8x128xf32> to vector<1x128xf32>
    %14 = vector.broadcast %13 : vector<1x128xf32> to vector<128x128xf32>
    %15 = arith.addf %12, %14 : vector<128x128xf32>
    %cst_10 = arith.constant 0.000000e+00 : f32
    %16 = vector.broadcast %cst_10 : f32 to vector<128x128xf32>
    %17 = arith.maximumf %15, %16 : vector<128x128xf32>
    %18 = arith.truncf %17 : vector<128x128xf32> to vector<128x128xbf16>
    %19 = vector.extract_strided_slice %2 {offsets = [0, 0, 0], sizes = [1, 128, 128], strides = [1, 1, 1]} : vector<3x128x128xbf16> to vector<1x128x128xbf16>
    %20 = vector.shape_cast %19 : vector<1x128x128xbf16> to vector<128x128xbf16>
    %cst_11 = arith.constant dense<0.000000e+00> : vector<128x128xf32>
    %21 = tpu.matmul %18, %20, %cst_11 {dimension_numbers = #tpu.dot_dimension_numbers<[1], [0], [0], [1], [0, 0, 1, 1], [], []>} : vector<128x128xbf16>, vector<128x128xbf16>, vector<128x128xf32> -> vector<128x128xf32>
    %22 = vector.extract_strided_slice %3 {offsets = [1, 0], sizes = [1, 128], strides = [1, 1]} : vector<8x128xf32> to vector<1x128xf32>
    %23 = vector.broadcast %22 : vector<1x128xf32> to vector<128x128xf32>
    %24 = arith.addf %21, %23 : vector<128x128xf32>
    %cst_12 = arith.constant 0.000000e+00 : f32
    %25 = vector.broadcast %cst_12 : f32 to vector<128x128xf32>
    %26 = arith.maximumf %24, %25 : vector<128x128xf32>
    %27 = arith.truncf %26 : vector<128x128xf32> to vector<128x128xbf16>
    %28 = vector.extract_strided_slice %2 {offsets = [1, 0, 0], sizes = [1, 128, 128], strides = [1, 1, 1]} : vector<3x128x128xbf16> to vector<1x128x128xbf16>
    %29 = vector.shape_cast %28 : vector<1x128x128xbf16> to vector<128x128xbf16>
    %cst_13 = arith.constant dense<0.000000e+00> : vector<128x128xf32>
    %30 = tpu.matmul %27, %29, %cst_13 {dimension_numbers = #tpu.dot_dimension_numbers<[1], [0], [0], [1], [0, 0, 1, 1], [], []>} : vector<128x128xbf16>, vector<128x128xbf16>, vector<128x128xf32> -> vector<128x128xf32>
    %31 = vector.extract_strided_slice %3 {offsets = [2, 0], sizes = [1, 128], strides = [1, 1]} : vector<8x128xf32> to vector<1x128xf32>
    %32 = vector.broadcast %31 : vector<1x128xf32> to vector<128x128xf32>
    %33 = arith.addf %30, %32 : vector<128x128xf32>
    %34 = tpu.iota {dimensions = array<i32: 1>} : vector<128x128xi32>
    %c2_i32 = arith.constant 2 : i32
    %35 = vector.broadcast %c2_i32 : i32 to vector<128x128xi32>
    %36 = arith.cmpi slt, %34, %35 : vector<128x128xi32>
    %cst_14 = arith.constant -1.000000e+30 : f32
    %37 = vector.broadcast %cst_14 : f32 to vector<128x128xf32>
    %38 = arith.select %36, %33, %37 : vector<128x128xi1>, vector<128x128xf32>
    %cst_15 = arith.constant dense<0xFF800000> : vector<128xf32>
    %39 = vector.multi_reduction <maximumf>, %38, %cst_15 [1] : vector<128x128xf32> to vector<128xf32>
    %40 = vector.shape_cast %39 : vector<128xf32> to vector<128x1xf32>
    %41 = vector.broadcast %40 : vector<128x1xf32> to vector<128x128xf32>
    %42 = arith.subf %38, %41 : vector<128x128xf32>
    %43 = math.exp %42 : vector<128x128xf32>
    %cst_16 = arith.constant dense<0.000000e+00> : vector<128xf32>
    %44 = vector.multi_reduction <add>, %43, %cst_16 [1] : vector<128x128xf32> to vector<128xf32>
    %45 = vector.shape_cast %44 : vector<128xf32> to vector<128x1xf32>
    %46 = math.log %45 : vector<128x1xf32>
    %47 = arith.addf %40, %46 : vector<128x1xf32>
    %48 = vector.broadcast %47 : vector<128x1xf32> to vector<128x128xf32>
    %49 = arith.subf %33, %48 : vector<128x128xf32>
    %cst_17 = arith.constant 0.000000e+00 : f32
    %50 = vector.broadcast %cst_17 : f32 to vector<128x128xf32>
    %51 = arith.select %36, %49, %50 : vector<128x128xi1>, vector<128x128xf32>
    %cst_18 = arith.constant 0.000000e+00 : f32
    %52 = vector.broadcast %cst_18 : f32 to vector<128x128xf32>
    %53 = arith.maximumf %33, %52 : vector<128x128xf32>
    %54 = arith.truncf %53 : vector<128x128xf32> to vector<128x128xbf16>
    %55 = vector.extract_strided_slice %2 {offsets = [2, 0, 0], sizes = [1, 128, 128], strides = [1, 1, 1]} : vector<3x128x128xbf16> to vector<1x128x128xbf16>
    %56 = vector.shape_cast %55 : vector<1x128x128xbf16> to vector<128x128xbf16>
    %cst_19 = arith.constant dense<0.000000e+00> : vector<128x128xf32>
    %57 = tpu.matmul %54, %56, %cst_19 {dimension_numbers = #tpu.dot_dimension_numbers<[1], [0], [0], [1], [0, 0, 1, 1], [], []>} : vector<128x128xbf16>, vector<128x128xbf16>, vector<128x128xf32> -> vector<128x128xf32>
    %58 = vector.extract_strided_slice %3 {offsets = [3, 0], sizes = [1, 128], strides = [1, 1]} : vector<8x128xf32> to vector<1x128xf32>
    %59 = vector.broadcast %58 : vector<1x128xf32> to vector<128x128xf32>
    %60 = arith.addf %57, %59 : vector<128x128xf32>
    %61 = math.tanh %60 : vector<128x128xf32>
    %62 = arith.addf %51, %61 : vector<128x128xf32>
    %63 = vector.extract_strided_slice %62 {offsets = [0, 0], sizes = [128, 8], strides = [1, 1]} : vector<128x128xf32> to vector<128x8xf32>
    %c0_20 = arith.constant 0 : index
    %c0_21 = arith.constant 0 : index
    %64 = vector.load %arg5[%c0_20, %c0_21] : memref<128x8xf32, #tpu.memory_space<vmem>>, vector<128x8xf32>
    tpu.vector_store %arg5[%c0_20, %c0_21], %63 {strides = array<i32>} : memref<128x8xf32, #tpu.memory_space<vmem>>, vector<128x8xf32>,
    return
  }
  func.func @transform_0(%arg0: i32) -> (i32, i32) {
    %c0_i32 = arith.constant 0 : i32
    %c0_i32_0 = arith.constant 0 : i32
    return %arg0, %c0_i32 : i32, i32
  }
  func.func @transform_1(%arg0: i32) -> (i32, i32) {
    %c0_i32 = arith.constant 0 : i32
    %c0_i32_0 = arith.constant 0 : i32
    %c0_i32_1 = arith.constant 0 : i32
    return %c0_i32, %c0_i32_0 : i32, i32
  }
  func.func @transform_2(%arg0: i32) -> (i32, i32, i32) {
    %c0_i32 = arith.constant 0 : i32
    %c0_i32_0 = arith.constant 0 : i32
    %c0_i32_1 = arith.constant 0 : i32
    %c0_i32_2 = arith.constant 0 : i32
    return %c0_i32, %c0_i32_0, %c0_i32_1 : i32, i32, i32
  }
  func.func @transform_3(%arg0: i32) -> (i32, i32) {
    %c0_i32 = arith.constant 0 : i32
    %c0_i32_0 = arith.constant 0 : i32
    %c0_i32_1 = arith.constant 0 : i32
    return %c0_i32, %c0_i32_0 : i32, i32
  }
  func.func @transform_4(%arg0: i32) -> (i32, i32) {
    %c0_i32 = arith.constant 0 : i32
    %c0_i32_0 = arith.constant 0 : i32
    return %arg0, %c0_i32 : i32, i32
  }
}

</mosaic_0001>

<bundles_post_ra>
// kernel: tpu_custom_call.1
= control target key start
LH: loop header
LB: loop body
LE: loop exit
PB: predicated region body
PF: predicated region fallthrough
CT: control target
= control target key end

     0   :  { %s1859_s15 = smov 0   ;;  %s2480_s0 = inlined_call_operand.vmem [shape: f32[256,8], index: 0, kind: input, shape index: {}]   ;;  %s2481_s1 = inlined_call_operand.vmem [shape: f32[8,128], index: 1, kind: input, shape index: {}]   ;;  %s2482_s2 = inlined_call_operand.vmem [shape: bf16[3,128,128], index: 2, kind: input, shape index: {}]   ;;  %s2483_s3 = inlined_call_operand.vmem [shape: f32[8,128], index: 3, kind: input, shape index: {}]   ;;  %s2484_s4 = inlined_call_operand.vmem [shape: f32[256,8], index: 4, kind: output, shape index: {}]  }
   0x1 LB: > { %s1412_s16 = sadd.s32 4294967295, %s1832_s15   ;;  %p1416_p0 = scmp.ge.s32.totalorder %s1832_s15, 1  ;;  %s1832_s15 = sphi %s1859_s15, %s14_s15  }
   0x2   : > { %p163_p1 = scmp.lt.s32.totalorder %s1832_s15, 3 }
   0x4   : > { %p164_p2 = pnand %p1416_p0, %p163_p1 }
   0x5   : > { %s1417_s17 = sshll.u32 (!%p164_p2), %s1412_s16, 4 }
   0x6   : > { %167 = sbr.rel (%p164_p2) target bundleno = 1137 (0x471), region = 36  ;;  %p190_p3 = scmp.lt.s32.totalorder (!%p164_p2), %s1417_s17, 31 }
   0xb   : > { %s2486_s17 = smov (!%p190_p3, %s1417_s17), 31  ;;  %vm284_vm0 = vcmask 64512   ;;  %v218_v48 = vld [vmem:[%s2481_s1] sm:$0xff]  ;;  %v1674_v49 = vld [vmem:[%s2482_s2 + $0x38] sm:$0xff]   ;;  %v1675_v50 = vld [vmem:[%s2482_s2 + $0x30] sm:$0xff]  }
   0xc   : > { %s1418_s18 = sshll.u32 %s2486_s17, 3  ;;  %1528 = vmatprep.subr.mxu0 %v218_v48  ;;  %1554 = vmatprep.subr.bf16.mxu1 %v1674_v49  ;;  %v1676_v51 = vld [vmem:[%s2482_s2 + $0x28] sm:$0xff]   ;;  %v1677_v52 = vld [vmem:[%s2482_s2 + $0x20] sm:$0xff]   ;;  %v1678_v53 = vld [vmem:[%s2482_s2 + $0x18] sm:$0xff]  }
   0xd   : > { %s1875_s21 = scalar_lea.vmem %s2480_s0, %s1418_s18  ;;  %1529 = vmatpush3.msra.mxu0 %v218_v48  ;;  %1555 = vmatpush3.bf16.msra.mxu1 %v1674_v49  ;;  %s2372_s30 = scalar_lea.vmem %s2484_s4, %s1418_s18 }
   0xe   : > { %v1878_v0 = vld [vmem:[%s1875_s21] sm:$0xff]  ;;  %v1881_v1 = vld [vmem:[%s1875_s21 + $0x10] sm:$0xff]  ;;  %v1884_v2 = vld [vmem:[%s1875_s21 + $0x8] sm:$0xff]  ;;  %1556 = vmatprep.subr.bf16.mxu1 %v1675_v50 }
   0xf   : > { %v268_v3 = vmul.f32 %v1878_v0, %v1878_v0  ;;  %v270_v4 = vmul.f32 %v1881_v1, %v1881_v1  ;;  %v269_v5 = vmul.f32 %v1884_v2, %v1884_v2  ;;  %v1893_v6 = vld [vmem:[%s1875_s21 + $0x18] sm:$0xff]  ;;  %v1896_v7 = vld [vmem:[%s1875_s21 + $0x20] sm:$0xff]  ;;  %v1899_v8 = vld [vmem:[%s1875_s21 + $0x28] sm:$0xff] }
  0x10   : > { %v271_v9 = vmul.f32 %v1893_v6, %v1893_v6  ;;  %v1904_v10 = vld [vmem:[%s1875_s21 + $0x30] sm:$0xff]  ;;  %v1907_v11 = vld [vmem:[%s1875_s21 + $0x38] sm:$0xff]  ;;  %v1912_v14 = vld [vmem:[%s1875_s21 + $0x40] sm:$0xff]  ;;  %v272_v16 = vmul.f32 %v1896_v7, %v1896_v7  ;;  %v273_v17 = vmul.f32 %v1899_v8, %v1899_v8 }
  0x11   : > { %v285_v12 = vsel %vm284_vm0, %v268_v3, 0.0  ;;  %v291_v13 = vsel %vm284_vm0, %v270_v4, 0.0  ;;  %v1915_v15 = vld [vmem:[%s1875_s21 + $0x48] sm:$0xff]  ;;  %v288_v18 = vsel %vm284_vm0, %v269_v5, 0.0  ;;  %v274_v20 = vmul.f32 %v1904_v10, %v1904_v10  ;;  %v1938_v30 = vld [vmem:[%s1875_s21 + $0x50] sm:$0xff]  ;;  %v1941_v31 = vld [vmem:[%s1875_s21 + $0x58] sm:$0xff]  ;;  %1557 = vmatpush3.bf16.msra.mxu1 %v1675_v50 }
  0x12   : > { %286 = vadd.xlane.f32.xlu0 %v285_v12  ;;  %292 = vadd.xlane.f32.xlu1 %v291_v13  ;;  %v294_v19 = vsel %vm284_vm0, %v271_v9, 0.0  ;;  %v275_v21 = vmul.f32 %v1907_v11, %v1907_v11  ;;  %v276_v22 = vmul.f32 %v1912_v14, %v1912_v14  ;;  %v277_v23 = vmul.f32 %v1915_v15, %v1915_v15  ;;  %v1948_v34 = vld [vmem:[%s1875_s21 + $0x60] sm:$0xff]  ;;  %v1951_v35 = vld [vmem:[%s1875_s21 + $0x68] sm:$0xff]  ;;  %v1960_v40 = vld [vmem:[%s1875_s21 + $0x70] sm:$0xff] }
  0x13   : > { %v297_v24 = vsel %vm284_vm0, %v272_v16, 0.0  ;;  %v300_v25 = vsel %vm284_vm0, %v273_v17, 0.0  ;;  %v303_v26 = vsel %vm284_vm0, %v274_v20, 0.0  ;;  %v278_v32 = vmul.f32 %v1938_v30, %v1938_v30  ;;  %v1963_v41 = vld [vmem:[%s1875_s21 + $0x78] sm:$0xff]  ;;  %1558 = vmatprep.subr.bf16.mxu1 %v1676_v51 }
  0x14   : > { %v306_v27 = vsel %vm284_vm0, %v275_v21, 0.0  ;;  %v309_v28 = vsel %vm284_vm0, %v276_v22, 0.0  ;;  %v312_v29 = vsel %vm284_vm0, %v277_v23, 0.0  ;;  %v279_v33 = vmul.f32 %v1941_v31, %v1941_v31 }
  0x15   : > { %v315_v36 = vsel %vm284_vm0, %v278_v32, 0.0  ;;  %v280_v38 = vmul.f32 %v1948_v34, %v1948_v34  ;;  %v281_v39 = vmul.f32 %v1951_v35, %v1951_v35  ;;  %v282_v44 = vmul.f32 %v1960_v40, %v1960_v40  ;;  %1559 = vmatpush3.bf16.msra.mxu1 %v1676_v51 }
  0x16   : > { %289 = vadd.xlane.f32.xlu0 %v288_v18  ;;  %295 = vadd.xlane.f32.xlu1 %v294_v19  ;;  %v318_v37 = vsel %vm284_vm0, %v279_v33, 0.0  ;;  %v283_v45 = vmul.f32 %v1963_v41, %v1963_v41 }
  0x17   : > { %v321_v42 = vsel %vm284_vm0, %v280_v38, 0.0  ;;  %v324_v43 = vsel %vm284_vm0, %v281_v39, 0.0  ;;  %v327_v46 = vsel %vm284_vm0, %v282_v44, 0.0  ;;  %1560 = vmatprep.subr.bf16.mxu1 %v1677_v52 }
  0x18   : > { %v330_v47 = vsel %vm284_vm0, %v283_v45, 0.0 }
  0x19   : > { %1561 = vmatpush3.bf16.msra.mxu1 %v1677_v52 }
  0x1a   : > { %298 = vadd.xlane.f32.xlu0 %v297_v24  ;;  %301 = vadd.xlane.f32.xlu1 %v300_v25 }
  0x1b   : > { %1562 = vmatprep.subr.bf16.mxu1 %v1678_v53 }
  0x1d   : > { %1563 = vmatpush3.bf16.msra.mxu1 %v1678_v53 }
  0x1e   : > { %304 = vadd.xlane.f32.xlu0 %v303_v26  ;;  %307 = vadd.xlane.f32.xlu1 %v306_v27 }
  0x22   : > { %310 = vadd.xlane.f32.xlu0 %v309_v28  ;;  %313 = vadd.xlane.f32.xlu1 %v312_v29 }
  0x26   : > { %316 = vadd.xlane.f32.xlu0 %v315_v36  ;;  %319 = vadd.xlane.f32.xlu1 %v318_v37 }
  0x2a   : > { %322 = vadd.xlane.f32.xlu0 %v321_v42  ;;  %325 = vadd.xlane.f32.xlu1 %v324_v43 }
  0x2e   : > { %328 = vadd.xlane.f32.xlu0 %v327_v46  ;;  %331 = vadd.xlane.f32.xlu1 %v330_v47 }
  0x9b   : > { %v287_v54 = vpop.xlane.xlu0 %286  ;;  %v293_v55 = vpop.xlane.xlu1 %292 }
  0x9c   : > { %v333_v56 = vmax.f32 %v287_v54, 1e-24  ;;  %v335_v57 = vmax.f32 %v293_v55, 1e-24 }
  0x9e   : > { %1698 = vrsqrt.f32 %v333_v56 }
  0x9f   : > { %1700 = vrsqrt.f32 %v335_v57  ;;  %v290_v58 = vpop.xlane.xlu0 %289  ;;  %v296_v59 = vpop.xlane.xlu1 %295 }
  0xa0   : > { %v334_v60 = vmax.f32 %v290_v58, 1e-24  ;;  %v336_v61 = vmax.f32 %v296_v59, 1e-24  ;;  %v1683_v58 = vld [vmem:[%s2482_s2 + $0x70] sm:$0xff]   ;;  %v1684_v59 = vld [vmem:[%s2482_s2 + $0x68] sm:$0xff]  }
  0xa2   : > { %1702 = vrsqrt.f32 %v334_v60  ;;  %v1685_v60 = vld [vmem:[%s2482_s2 + $0x60] sm:$0xff]  }
  0xa3   : > { %1704 = vrsqrt.f32 %v336_v61  ;;  %v299_v62 = vpop.xlane.xlu0 %298  ;;  %v302_v63 = vpop.xlane.xlu1 %301  ;;  %v1686_v61 = vld [vmem:[%s2482_s2 + $0x58] sm:$0xff]  }
  0xa4   : > { %v337_v3 = vmax.f32 %v299_v62, 1e-24  ;;  %v338_v4 = vmax.f32 %v302_v63, 1e-24  ;;  %v381_v62 = vlaneseq }
  0xa6   : > { %1706 = vrsqrt.f32 %v337_v3  ;;  %v2048_v63 = vshrl.u32 %v381_v62, 7 }
  0xa7   : > { %1708 = vrsqrt.f32 %v338_v4  ;;  %v305_v5 = vpop.xlane.xlu0 %304  ;;  %v308_v9 = vpop.xlane.xlu1 %307  ;;  %v2054_v4 = vld [vmem:[%s2483_s3] sm:$0xff] }
  0xa8   : > { %v339_v12 = vmax.f32 %v305_v5, 1e-24  ;;  %v340_v13 = vmax.f32 %v308_v9, 1e-24  ;;  %v383_v3 = vsub.s32 0, %v2048_v63 }
  0xaa   : > { %1710 = vrsqrt.f32 %v339_v12  ;;  %v384_v5 = vrot.slane %v2054_v4, %v383_v3  ;;  %v1690_v3 = vld [vmem:[%s2482_s2 + $0xb8] sm:$0xff]  }
  0xab   : > { %v1699_v16 = vpop.eup %1698  ;;  %1712 = vrsqrt.f32 %v340_v13  ;;  %v311_v17 = vpop.xlane.xlu0 %310 }
  0xac   : > { %v314_v18 = vpop.xlane.xlu1 %313  ;;  %v1701_v19 = vpop.eup %1700  ;;  %v365_v20 = vmul.f32 %v1699_v16, %v1878_v0  ;;  %v341_v21 = vmax.f32 %v311_v17, 1e-24 }
  0xad   : > { %v342_v22 = vmax.f32 %v314_v18, 1e-24  ;;  %v367_v26 = vmul.f32 %v1701_v19, %v1881_v1 }
  0xae   : > { %1530 = vmatprep.mubr.msk.f32.mxu0 %vm284_vm0, %v365_v20  ;;  %1714 = vrsqrt.f32 %v341_v21 }
  0xaf   : > { %v1703_v23 = vpop.eup %1702  ;;  %1716 = vrsqrt.f32 %v342_v22  ;;  %v317_v24 = vpop.xlane.xlu0 %316 }
  0xb0   : > { %v320_v25 = vpop.xlane.xlu1 %319  ;;  %v1705_v27 = vpop.eup %1704  ;;  %v366_v28 = vmul.f32 %v1703_v23, %v1884_v2  ;;  %v343_v29 = vmax.f32 %v317_v24, 1e-24 }
  0xb1   : > { %v344_v32 = vmax.f32 %v320_v25, 1e-24  ;;  %v368_v0 = vmul.f32 %v1705_v27, %v1893_v6 }
  0xb2   : > { %1531 = vmatmul.mubr.msk.f32.vlgmr.msra.gmra.mxu0 %vm284_vm0, %v366_v28  ;;  %1718 = vrsqrt.f32 %v343_v29 }
  0xb3   : > { %v1707_v33 = vpop.eup %1706  ;;  %1720 = vrsqrt.f32 %v344_v32  ;;  %1533 = vmatprep.mubr.msk.f32.mxu0 %vm284_vm0, %v367_v26  ;;  %v323_v36 = vpop.xlane.xlu0 %322 }
  0xb4   : > { %v326_v37 = vpop.xlane.xlu1 %325  ;;  %v1709_v38 = vpop.eup %1708  ;;  %v345_v39 = vmax.f32 %v323_v36, 1e-24  ;;  %v369_v1 = vmul.f32 %v1707_v33, %v1896_v7 }
  0xb5   : > { %v346_v42 = vmax.f32 %v326_v37, 1e-24  ;;  %v370_v2 = vmul.f32 %v1709_v38, %v1899_v8 }
  0xb6   : > { %1534 = vmatmul.mubr.msk.f32.gmra.mxu0 %vm284_vm0, %v368_v0  ;;  %1722 = vrsqrt.f32 %v345_v39 }
  0xb7   : > { %v1711_v43 = vpop.eup %1710  ;;  %1724 = vrsqrt.f32 %v346_v42  ;;  %1536 = vmatprep.mubr.msk.f32.mxu0 %vm284_vm0, %v369_v1  ;;  %v329_v6 = vpop.xlane.xlu0 %328 }
  0xb8   : > { %v332_v44 = vpop.xlane.xlu1 %331  ;;  %v1713_v45 = vpop.eup %1712  ;;  %v347_v46 = vmax.f32 %v329_v6, 1e-24  ;;  %v371_v48 = vmul.f32 %v1711_v43, %v1904_v10 }
  0xb9   : > { %v348_v47 = vmax.f32 %v332_v44, 1e-24  ;;  %v372_v7 = vmul.f32 %v1713_v45, %v1907_v11 }
  0xba   : > { %1537 = vmatmul.mubr.msk.f32.gmra.mxu0 %vm284_vm0, %v370_v2  ;;  %1726 = vrsqrt.f32 %v347_v46 }
  0xbb   : > { %v1715_v49 = vpop.eup %1714  ;;  %1728 = vrsqrt.f32 %v348_v47  ;;  %1539 = vmatprep.mubr.msk.f32.mxu0 %vm284_vm0, %v371_v48 }
  0xbc   : > { %v1717_v8 = vpop.eup %1716  ;;  %v373_v50 = vmul.f32 %v1715_v49, %v1912_v14 }
  0xbd   : > { %v374_v51 = vmul.f32 %v1717_v8, %v1915_v15 }
  0xbe   : > { %1540 = vmatmul.mubr.msk.f32.gmra.mxu0 %vm284_vm0, %v372_v7 }
  0xbf   : > { %v1719_v52 = vpop.eup %1718  ;;  %1542 = vmatprep.mubr.msk.f32.mxu0 %vm284_vm0, %v373_v50 }
  0xc0   : > { %v1721_v10 = vpop.eup %1720  ;;  %v375_v53 = vmul.f32 %v1719_v52, %v1938_v30 }
  0xc1   : > { %v376_v11 = vmul.f32 %v1721_v10, %v1941_v31 }
  0xc2   : > { %1543 = vmatmul.mubr.msk.f32.gmra.mxu0 %vm284_vm0, %v374_v51 }
  0xc3   : > { %v1723_v54 = vpop.eup %1722  ;;  %1545 = vmatprep.mubr.msk.f32.mxu0 %vm284_vm0, %v375_v53 }
  0xc4   : > { %v1725_v55 = vpop.eup %1724  ;;  %v377_v14 = vmul.f32 %v1723_v54, %v1948_v34  ;;  %v1679_v34 = vld [vmem:[%s2482_s2 + $0x10] sm:$0xff]  }
  0xc5   : > { %v378_v15 = vmul.f32 %v1725_v55, %v1951_v35  ;;  %1564 = vmatprep.subr.bf16.mxu1 %v1679_v34  ;;  %v1680_v35 = vld [vmem:[%s2482_s2 + $0x8] sm:$0xff]  }
  0xc6   : > { %1546 = vmatmul.mubr.msk.f32.gmra.mxu0 %vm284_vm0, %v376_v11  ;;  %1565 = vmatpush3.bf16.msra.mxu1 %v1679_v34 }
  0xc7   : > { %v1727_v56 = vpop.eup %1726  ;;  %1548 = vmatprep.mubr.msk.f32.mxu0 %vm284_vm0, %v377_v14  ;;  %1566 = vmatprep.subr.bf16.mxu1 %v1680_v35 }
  0xc8   : > { %v1729_v57 = vpop.eup %1728  ;;  %v379_v30 = vmul.f32 %v1727_v56, %v1960_v40  ;;  %v1681_v40 = vld [vmem:[%s2482_s2] sm:$0xff]  }
  0xc9   : > { %v380_v31 = vmul.f32 %v1729_v57, %v1963_v41  ;;  %v1682_v41 = vld [vmem:[%s2482_s2 + $0x78] sm:$0xff]  }
  0xca   : > { %1549 = vmatmul.mubr.msk.f32.gmra.mxu0 %vm284_vm0, %v378_v15  ;;  %1567 = vmatpush3.bf16.msra.mxu1 %v1680_v35 }
  0xcb   : > { %1551 = vmatprep.mubr.msk.f32.mxu0 %vm284_vm0, %v379_v30  ;;  %1568 = vmatprep.subr.bf16.mxu1 %v1681_v40 }
  0xcc   : > { %1586 = vmatprep.subr.bf16.mxu0 %v1682_v41 }
  0xcd   : > { %1587 = vmatpush3.bf16.msra.mxu0 %v1682_v41 }
  0xce   : > { %1552 = vmatmul.mubr.msk.f32.gmra.mxu0 %vm284_vm0, %v380_v31  ;;  %1569 = vmatpush3.bf16.msra.mxu1 %v1681_v40 }
  0xcf   : > { %1588 = vmatprep.subr.bf16.mxu0 %v1683_v58  ;;  %1650 = vmatprep.subr.bf16.mxu1 %v1690_v3 }
  0xd1   : > { %1589 = vmatpush3.bf16.msra.mxu0 %v1683_v58 }
  0xd2   : > { %1590 = vmatprep.subr.bf16.mxu0 %v1684_v59 }
  0xd5   : > { %1591 = vmatpush3.bf16.msra.mxu0 %v1684_v59  ;;  %v1687_v59 = vld [vmem:[%s2482_s2 + $0x50] sm:$0xff]  }
  0xd6   : > { %1592 = vmatprep.subr.bf16.mxu0 %v1685_v60 }
  0xd9   : > { %1593 = vmatpush3.bf16.msra.mxu0 %v1685_v60  ;;  %v1688_v60 = vld [vmem:[%s2482_s2 + $0x48] sm:$0xff]  }
  0xda   : > { %1594 = vmatprep.subr.bf16.mxu0 %v1686_v61 }
  0xdd   : > { %1595 = vmatpush3.bf16.msra.mxu0 %v1686_v61  ;;  %v1689_v61 = vld [vmem:[%s2482_s2 + $0x40] sm:$0xff]  }
  0xde   : > { %1596 = vmatprep.subr.bf16.mxu0 %v1687_v59 }
  0xe1   : > { %1597 = vmatpush3.bf16.msra.mxu0 %v1687_v59 }
  0xe2   : > { %1598 = vmatprep.subr.bf16.mxu0 %v1688_v60 }
  0xe5   : > { %1599 = vmatpush3.bf16.msra.mxu0 %v1688_v60 }
  0xe6   : > { %1600 = vmatprep.subr.bf16.mxu0 %v1689_v61 }
  0xe9   : > { %1601 = vmatpush3.bf16.msra.mxu0 %v1689_v61 }
  0xea   : > { %1618 = vmatprep.subr.bf16.mxu0 %v1690_v3 }
 0x172   : > { %v1532_v9 = vpop.f32.mrf.mxu0 }
 0x173   : > { %v505_v12 = vadd.f32 %v1532_v9, %v384_v5  ;;  %v1692_v9 = vld [vmem:[%s2482_s2 + $0xa8] sm:$0xff]  }
 0x174   : > { %v499_v13 = vpop.f32.mrf.mxu0 }
 0x175   : > { %v500_v16 = vadd.f32 %v499_v13, %v384_v5  ;;  %v579_v18 = vmax.f32 %v505_v12, 0.0  ;;  %v1693_v12 = vld [vmem:[%s2482_s2 + $0xa0] sm:$0xff]   ;;  %v2081_v13 = vld [vmem:[%s2482_s2 + $0x98] sm:$0xff]  }
 0x176   : > { %v1535_v17 = vpop.f32.mrf.mxu0 }
 0x177   : > { %v578_v19 = vmax.f32 %v500_v16, 0.0  ;;  %v515_v20 = vadd.f32 %v1535_v17, %v384_v5  ;;  %v604_v16 = vsub.s32 1, %v2048_v63 }
 0x178   : > { %v509_v21 = vpop.f32.mrf.mxu0 }
 0x179   : > { %v510_v22 = vadd.f32 %v509_v21, %v384_v5  ;;  %v594_v23 = vpack.c.bf16 %v579_v18, %v578_v19  ;;  %v581_v25 = vmax.f32 %v515_v20, 0.0  ;;  %v2087_v18 = vrot.slane %v2054_v4, %v604_v16 }
 0x17a   : > { %v1538_v24 = vpop.f32.mrf.mxu0  ;;  %v777_v16 = vsub.s32 2, %v2048_v63 }
 0x17b   : > { %v580_v26 = vmax.f32 %v510_v22, 0.0  ;;  %v525_v27 = vadd.f32 %v1538_v24, %v384_v5  ;;  %1570 = vmatprep.mubr.bf16.mxu1 %v594_v23 }
 0x17c   : > { %v519_v28 = vpop.f32.mrf.mxu0 }
 0x17d   : > { %v595_v29 = vpack.c.bf16 %v581_v25, %v580_v26  ;;  %v520_v32 = vadd.f32 %v519_v28, %v384_v5  ;;  %v583_v33 = vmax.f32 %v525_v27, 0.0 }
 0x17e   : > { %v1541_v0 = vpop.f32.mrf.mxu0 }
 0x17f   : > { %v582_v36 = vmax.f32 %v520_v32, 0.0  ;;  %v535_v37 = vadd.f32 %v1541_v0, %v384_v5  ;;  %1571 = vmatmul.mubr.bf16.vlgmr.msra.gmra.mxu1 %v595_v29 }
 0x180   : > { %v529_v38 = vpop.f32.mrf.mxu0  ;;  %1658 = vmatpush3.bf16.msra.mxu1 %v1690_v3 }
 0x181   : > { %v596_v39 = vpack.c.bf16 %v583_v33, %v582_v36  ;;  %v530_v42 = vadd.f32 %v529_v38, %v384_v5  ;;  %v585_v2 = vmax.f32 %v535_v37, 0.0 }
 0x182   : > { %v1544_v1 = vpop.f32.mrf.mxu0 }
 0x183   : > { %v584_v43 = vmax.f32 %v530_v42, 0.0  ;;  %v545_v6 = vadd.f32 %v1544_v1, %v384_v5  ;;  %1574 = vmatprep.mubr.bf16.mxu1 %v596_v39 }
 0x184   : > { %v539_v44 = vpop.f32.mrf.mxu0 }
 0x185   : > { %v597_v45 = vpack.c.bf16 %v585_v2, %v584_v43  ;;  %v540_v46 = vadd.f32 %v539_v44, %v384_v5  ;;  %v587_v48 = vmax.f32 %v545_v6, 0.0 }
 0x186   : > { %v1547_v47 = vpop.f32.mrf.mxu0 }
 0x187   : > { %v586_v7 = vmax.f32 %v540_v46, 0.0  ;;  %v555_v49 = vadd.f32 %v1547_v47, %v384_v5  ;;  %1575 = vmatmul.mubr.bf16.gmra.mxu1 %v597_v45 }
 0x188   : > { %v549_v8 = vpop.f32.mrf.mxu0 }
 0x189   : > { %v598_v50 = vpack.c.bf16 %v587_v48, %v586_v7  ;;  %v550_v51 = vadd.f32 %v549_v8, %v384_v5  ;;  %v589_v10 = vmax.f32 %v555_v49, 0.0 }
 0x18a   : > { %v1550_v52 = vpop.f32.mrf.mxu0 }
 0x18b   : > { %v588_v53 = vmax.f32 %v550_v51, 0.0  ;;  %v565_v11 = vadd.f32 %v1550_v52, %v384_v5  ;;  %1578 = vmatprep.mubr.bf16.mxu1 %v598_v50 }
 0x18c   : > { %v559_v54 = vpop.f32.mrf.mxu0 }
 0x18d   : > { %v599_v55 = vpack.c.bf16 %v589_v10, %v588_v53  ;;  %v560_v14 = vadd.f32 %v559_v54, %v384_v5  ;;  %v591_v56 = vmax.f32 %v565_v11, 0.0 }
 0x18e   : > { %v1553_v15 = vpop.f32.mrf.mxu0 }
 0x18f   : > { %v590_v57 = vmax.f32 %v560_v14, 0.0  ;;  %v575_v30 = vadd.f32 %v1553_v15, %v384_v5  ;;  %1579 = vmatmul.mubr.bf16.gmra.mxu1 %v599_v55 }
 0x190   : > { %v569_v31 = vpop.f32.mrf.mxu0 }
 0x191   : > { %v600_v34 = vpack.c.bf16 %v591_v56, %v590_v57  ;;  %v570_v35 = vadd.f32 %v569_v31, %v384_v5  ;;  %v593_v40 = vmax.f32 %v575_v30, 0.0  ;;  %v1691_v5 = vld [vmem:[%s2482_s2 + $0xb0] sm:$0xff]  }
 0x192   : > { %1651 = vmatprep.subr.bf16.mxu1 %v1691_v5 }
 0x193   : > { %v592_v41 = vmax.f32 %v570_v35, 0.0  ;;  %1582 = vmatprep.mubr.bf16.mxu1 %v600_v34  ;;  %1659 = vmatpush3.bf16.msra.mxu1 %v1691_v5 }
 0x194   : > { %1652 = vmatprep.subr.bf16.mxu1 %v1692_v9 }
 0x195   : > { %v601_v58 = vpack.c.bf16 %v593_v40, %v592_v41 }
 0x197   : > { %1583 = vmatmul.mubr.bf16.gmra.mxu1 %v601_v58 }
 0x198   : > { %1660 = vmatpush3.bf16.msra.mxu1 %v1692_v9 }
 0x199   : > { %1653 = vmatprep.subr.bf16.mxu1 %v1693_v12 }
 0x19c   : > { %1661 = vmatpush3.bf16.msra.mxu1 %v1693_v12 }
 0x19d   : > { %1654 = vmatprep.subr.bf16.mxu1 %v2081_v13 }
 0x1a0   : > { %1662 = vmatpush3.bf16.msra.mxu1 %v2081_v13 }
 0x23f   : > { %v1572_v17 = vpop.f32.mrf.mxu1 }
 0x240   : > { %v697_v23 = vadd.f32 %v1572_v17, %v2087_v18  ;;  %v2118_v17 = vand.u32 127, %v381_v62 }
 0x241   : > { %v688_v19 = vpop.f32.mrf.mxu1 }
 0x242   : > { %v689_v21 = vadd.f32 %v688_v19, %v2087_v18  ;;  %v753_v32 = vmax.f32 %v697_v23, 0.0  ;;  %vm926_vm1 = vcmp.lt.s32.totalorder %v2118_v17, 2 }
 0x243   : > { %v1573_v20 = vpop.f32.mrf.mxu1 }
 0x244   : > { %v700_v22 = vadd.f32 %v1573_v20, %v2087_v18  ;;  %v751_v28 = vmax.f32 %v689_v21, 0.0 }
 0x245   : > { %v691_v24 = vpop.f32.mrf.mxu1 }
 0x246   : > { %v692_v25 = vadd.f32 %v691_v24, %v2087_v18  ;;  %v754_v26 = vmax.f32 %v700_v22, 0.0 }
 0x247   : > { %v1576_v27 = vpop.f32.mrf.mxu1 }
 0x248   : > { %v752_v29 = vmax.f32 %v692_v25, 0.0  ;;  %v768_v36 = vpack.c.bf16 %v754_v26, %v753_v32  ;;  %v713_v42 = vadd.f32 %v1576_v27, %v2087_v18 }
 0x249   : > { %v704_v0 = vpop.f32.mrf.mxu1 }
 0x24a   : > { %v767_v33 = vpack.c.bf16 %v752_v29, %v751_v28  ;;  %v705_v38 = vadd.f32 %v704_v0, %v2087_v18  ;;  %v757_v46 = vmax.f32 %v713_v42, 0.0 }
 0x24b   : > { %v1577_v37 = vpop.f32.mrf.mxu1 }
 0x24c   : > { %v716_v39 = vadd.f32 %v1577_v37, %v2087_v18  ;;  %1602 = vmatprep.mubr.bf16.mxu0 %v767_v33  ;;  %v755_v44 = vmax.f32 %v705_v38, 0.0 }
 0x24d   : > { %v707_v1 = vpop.f32.mrf.mxu1  ;;  %1603 = vmatmul.mubr.bf16.vlgmr.msra.gmra.mxu0 %v768_v36 }
 0x24e   : > { %v708_v2 = vadd.f32 %v707_v1, %v2087_v18  ;;  %1619 = vmatpush3.bf16.msra.mxu0 %v1690_v3  ;;  %v758_v43 = vmax.f32 %v716_v39, 0.0 }
 0x24f   : > { %v1580_v6 = vpop.f32.mrf.mxu1  ;;  %1620 = vmatprep.subr.bf16.mxu0 %v1691_v5 }
 0x250   : > { %v756_v45 = vmax.f32 %v708_v2, 0.0  ;;  %v770_v7 = vpack.c.bf16 %v758_v43, %v757_v46  ;;  %v729_v51 = vadd.f32 %v1580_v6, %v2087_v18 }
 0x251   : > { %v720_v47 = vpop.f32.mrf.mxu1 }
 0x252   : > { %v769_v48 = vpack.c.bf16 %v756_v45, %v755_v44  ;;  %1621 = vmatpush3.bf16.msra.mxu0 %v1691_v5  ;;  %v721_v8 = vadd.f32 %v720_v47, %v2087_v18  ;;  %v761_v14 = vmax.f32 %v729_v51, 0.0 }
 0x253   : > { %v1581_v49 = vpop.f32.mrf.mxu1  ;;  %1622 = vmatprep.subr.bf16.mxu0 %v1692_v9 }
 0x254   : > { %v732_v50 = vadd.f32 %v1581_v49, %v2087_v18  ;;  %1606 = vmatprep.mubr.bf16.mxu0 %v769_v48  ;;  %v759_v54 = vmax.f32 %v721_v8, 0.0 }
 0x255   : > { %v723_v52 = vpop.f32.mrf.mxu1  ;;  %1607 = vmatmul.mubr.bf16.gmra.mxu0 %v770_v7 }
 0x256   : > { %v724_v10 = vadd.f32 %v723_v52, %v2087_v18  ;;  %1623 = vmatpush3.bf16.msra.mxu0 %v1692_v9  ;;  %v762_v53 = vmax.f32 %v732_v50, 0.0  ;;  %v1695_v9 = vld [vmem:[%s2482_s2 + $0x90] sm:$0xff]  }
 0x257   : > { %v1584_v11 = vpop.f32.mrf.mxu1  ;;  %1624 = vmatprep.subr.bf16.mxu0 %v1693_v12  ;;  %1655 = vmatprep.subr.bf16.mxu1 %v1695_v9 }
 0x258   : > { %v760_v55 = vmax.f32 %v724_v10, 0.0  ;;  %v772_v57 = vpack.c.bf16 %v762_v53, %v761_v14  ;;  %v745_v35 = vadd.f32 %v1584_v11, %v2087_v18  ;;  %1663 = vmatpush3.bf16.msra.mxu1 %v1695_v9 }
 0x259   : > { %v736_v15 = vpop.f32.mrf.mxu1 }
 0x25a   : > { %v771_v56 = vpack.c.bf16 %v760_v55, %v759_v54  ;;  %1625 = vmatpush3.bf16.msra.mxu0 %v1693_v12  ;;  %v737_v31 = vadd.f32 %v736_v15, %v2087_v18  ;;  %v765_v61 = vmax.f32 %v745_v35, 0.0  ;;  %v1696_v12 = vld [vmem:[%s2482_s2 + $0x88] sm:$0xff]  }
 0x25b   : > { %v1585_v30 = vpop.f32.mrf.mxu1  ;;  %1626 = vmatprep.subr.bf16.mxu0 %v2081_v13  ;;  %1656 = vmatprep.subr.bf16.mxu1 %v1696_v12 }
 0x25c   : > { %v748_v34 = vadd.f32 %v1585_v30, %v2087_v18  ;;  %1610 = vmatprep.mubr.bf16.mxu0 %v771_v56  ;;  %v763_v59 = vmax.f32 %v737_v31, 0.0  ;;  %1664 = vmatpush3.bf16.msra.mxu1 %v1696_v12 }
 0x25d   : > { %v739_v40 = vpop.f32.mrf.mxu1  ;;  %1611 = vmatmul.mubr.bf16.gmra.mxu0 %v772_v57 }
 0x25e   : > { %v740_v41 = vadd.f32 %v739_v40, %v2087_v18  ;;  %1627 = vmatpush3.bf16.msra.mxu0 %v2081_v13  ;;  %v766_v58 = vmax.f32 %v748_v34, 0.0  ;;  %v1697_v13 = vld [vmem:[%s2482_s2 + $0x80] sm:$0xff]   ;;  %v2121_v18 = vrot.slane %v2054_v4, %v777_v16 }
 0x25f   : > { %1628 = vmatprep.subr.bf16.mxu0 %v1695_v9  ;;  %1657 = vmatprep.subr.bf16.mxu1 %v1697_v13 }
 0x260   : > { %v764_v60 = vmax.f32 %v740_v41, 0.0  ;;  %v774_v5 = vpack.c.bf16 %v766_v58, %v765_v61  ;;  %1665 = vmatpush3.bf16.msra.mxu1 %v1697_v13 }
 0x262   : > { %v773_v3 = vpack.c.bf16 %v764_v60, %v763_v59  ;;  %1629 = vmatpush3.bf16.msra.mxu0 %v1695_v9 }
 0x263   : > { %1630 = vmatprep.subr.bf16.mxu0 %v1696_v12 }
 0x264   : > { %1614 = vmatprep.mubr.bf16.mxu0 %v773_v3 }
 0x265   : > { %1615 = vmatmul.mubr.bf16.gmra.mxu0 %v774_v5 }
 0x266   : > { %1631 = vmatpush3.bf16.msra.mxu0 %v1696_v12 }
 0x267   : > { %1632 = vmatprep.subr.bf16.mxu0 %v1697_v13 }
 0x26a   : > { %1633 = vmatpush3.bf16.msra.mxu0 %v1697_v13 }
 0x30d   : > { %v1604_v19 = vpop.f32.mrf.mxu0 }
 0x30e   : > { %v2125_v20 = vadd.f32 %v1604_v19, %v2121_v18 }
 0x30f   : > { %v861_v21 = vpop.f32.mrf.mxu0 }
 0x310   : > { %v2128_v22 = vadd.f32 %v861_v21, %v2121_v18  ;;  %v2133_v23 = vsel %vm926_vm1, %v2125_v20, -1e+30  ;;  %v1137_v37 = vmax.f32 %v2125_v20, 0.0 }
 0x311   : > { %947 = vmax.xlane.f32.xlu0 %v2133_v23  ;;  %v1605_v62 = vpop.f32.mrf.mxu0 }
 0x312   : > { %v2137_v24 = vadd.f32 %v1605_v62, %v2121_v18  ;;  %v2150_v28 = vsel %vm926_vm1, %v2128_v22, -1e+30  ;;  %v1135_v0 = vmax.f32 %v2128_v22, 0.0 }
 0x313   : > { %v864_v25 = vpop.f32.mrf.mxu0 }
 0x314   : > { %v2140_v26 = vadd.f32 %v864_v25, %v2121_v18  ;;  %v2145_v27 = vsel %vm926_vm1, %v2137_v24, -1e+30  ;;  %v1138_v29 = vmax.f32 %v2137_v24, 0.0 }
 0x315   : > { %949 = vmax.xlane.f32.xlu1 %v2145_v27  ;;  %v1608_v32 = vpop.f32.mrf.mxu0  ;;  %943 = vmax.xlane.f32.xlu0 %v2150_v28 }
 0x316   : > { %v1136_v33 = vmax.f32 %v2140_v26, 0.0  ;;  %v2158_v36 = vadd.f32 %v1608_v32, %v2121_v18  ;;  %v2167_v42 = vsel %vm926_vm1, %v2140_v26, -1e+30  ;;  %v1152_v43 = vpack.c.bf16 %v1138_v29, %v1137_v37 }
 0x317   : > { %v877_v38 = vpop.f32.mrf.mxu0 }
 0x318   : > { %v2162_v39 = vadd.f32 %v877_v38, %v2121_v18  ;;  %v2172_v1 = vsel %vm926_vm1, %v2158_v36, -1e+30  ;;  %v1151_v2 = vpack.c.bf16 %v1136_v33, %v1135_v0  ;;  %v1141_v52 = vmax.f32 %v2158_v36, 0.0 }
 0x319   : > { %v1609_v6 = vpop.f32.mrf.mxu0  ;;  %945 = vmax.xlane.f32.xlu1 %v2167_v42  ;;  %955 = vmax.xlane.f32.xlu0 %v2172_v1 }
 0x31a   : > { %v2177_v44 = vadd.f32 %v1609_v6, %v2121_v18  ;;  %1634 = vmatprep.mubr.bf16.mxu0 %v1151_v2  ;;  %v2190_v48 = vsel %vm926_vm1, %v2162_v39, -1e+30  ;;  %v1139_v8 = vmax.f32 %v2162_v39, 0.0 }
 0x31b   : > { %v880_v45 = vpop.f32.mrf.mxu0  ;;  %1635 = vmatmul.mubr.bf16.vlgmr.msra.gmra.mxu0 %v1152_v43 }
 0x31c   : > { %v2180_v46 = vadd.f32 %v880_v45, %v2121_v18  ;;  %v2185_v47 = vsel %vm926_vm1, %v2177_v44, -1e+30  ;;  %v1142_v7 = vmax.f32 %v2177_v44, 0.0 }
 0x31d   : > { %v1612_v49 = vpop.f32.mrf.mxu0  ;;  %957 = vmax.xlane.f32.xlu1 %v2185_v47  ;;  %951 = vmax.xlane.f32.xlu0 %v2190_v48 }
 0x31e   : > { %v1140_v50 = vmax.f32 %v2180_v46, 0.0  ;;  %v2198_v51 = vadd.f32 %v1612_v49, %v2121_v18  ;;  %v2207_v11 = vsel %vm926_vm1, %v2180_v46, -1e+30  ;;  %v1154_v14 = vpack.c.bf16 %v1142_v7, %v1141_v52 }
 0x31f   : > { %v893_v10 = vpop.f32.mrf.mxu0 }
 0x320   : > { %v2202_v53 = vadd.f32 %v893_v10, %v2121_v18  ;;  %v2212_v54 = vsel %vm926_vm1, %v2198_v51, -1e+30  ;;  %v1153_v55 = vpack.c.bf16 %v1140_v50, %v1139_v8  ;;  %v1145_v59 = vmax.f32 %v2198_v51, 0.0 }
 0x321   : > { %v1613_v15 = vpop.f32.mrf.mxu0  ;;  %953 = vmax.xlane.f32.xlu1 %v2207_v11  ;;  %963 = vmax.xlane.f32.xlu0 %v2212_v54 }
 0x322   : > { %v2217_v56 = vadd.f32 %v1613_v15, %v2121_v18  ;;  %1638 = vmatprep.mubr.bf16.mxu1 %v1153_v55  ;;  %v2230_v34 = vsel %vm926_vm1, %v2202_v53, -1e+30  ;;  %v1143_v41 = vmax.f32 %v2202_v53, 0.0 }
 0x323   : > { %v896_v57 = vpop.f32.mrf.mxu0  ;;  %1639 = vmatmul.mubr.bf16.vlgmr.msra.gmra.mxu1 %v1154_v14 }
 0x324   : > { %v2220_v30 = vadd.f32 %v896_v57, %v2121_v18  ;;  %v2225_v31 = vsel %vm926_vm1, %v2217_v56, -1e+30  ;;  %v1146_v35 = vmax.f32 %v2217_v56, 0.0 }
 0x325   : > { %965 = vmax.xlane.f32.xlu1 %v2225_v31  ;;  %959 = vmax.xlane.f32.xlu0 %v2230_v34  ;;  %v1616_v40 = vpop.f32.mrf.mxu0 }
 0x326   : > { %v1144_v58 = vmax.f32 %v2220_v30, 0.0  ;;  %v2244_v3 = vsel %vm926_vm1, %v2220_v30, -1e+30  ;;  %v1156_v12 = vpack.c.bf16 %v1146_v35, %v1145_v59  ;;  %v2248_v13 = vadd.f32 %v1616_v40, %v2121_v18 }
 0x327   : > { %v909_v60 = vpop.f32.mrf.mxu0 }
 0x328   : > { %v2239_v61 = vadd.f32 %v909_v60, %v2121_v18  ;;  %v1155_v5 = vpack.c.bf16 %v1144_v58, %v1143_v41  ;;  %v2273_v33 = vsel %vm926_vm1, %v2248_v13, -1e+30  ;;  %v1149_v37 = vmax.f32 %v2248_v13, 0.0 }
 0x329   : > { %961 = vmax.xlane.f32.xlu1 %v2244_v3  ;;  %v1617_v9 = vpop.f32.mrf.mxu0 }
 0x32a   : > { %v2251_v16 = vadd.f32 %v1617_v9, %v2121_v18  ;;  %1642 = vmatprep.mubr.bf16.mxu1 %v1155_v5  ;;  %v2256_v19 = vsel %vm926_vm1, %v2239_v61, -1e+30  ;;  %v1147_v29 = vmax.f32 %v2239_v61, 0.0 }
 0x32b   : > { %v912_v21 = vpop.f32.mrf.mxu0  ;;  %1643 = vmatmul.mubr.bf16.gmra.mxu1 %v1156_v12  ;;  %967 = vmax.xlane.f32.xlu0 %v2256_v19 }
 0x32c   : > { %v2260_v62 = vadd.f32 %v912_v21, %v2121_v18  ;;  %v1150_v25 = vmax.f32 %v2251_v16, 0.0  ;;  %v2281_v2 = vsel %vm926_vm1, %v2251_v16, -1e+30 }
 0x32e   : > { %v1148_v32 = vmax.f32 %v2260_v62, 0.0  ;;  %v2268_v0 = vsel %vm926_vm1, %v2260_v62, -1e+30  ;;  %v1158_v38 = vpack.c.bf16 %v1150_v25, %v1149_v37 }
 0x32f   : > { %969 = vmax.xlane.f32.xlu1 %v2268_v0  ;;  %971 = vmax.xlane.f32.xlu0 %v2273_v33 }
 0x330   : > { %v1157_v18 = vpack.c.bf16 %v1148_v32, %v1147_v29 }
 0x332   : > { %1646 = vmatprep.mubr.bf16.mxu1 %v1157_v18 }
 0x333   : > { %973 = vmax.xlane.f32.xlu1 %v2281_v2  ;;  %1647 = vmatmul.mubr.bf16.gmra.mxu1 %v1158_v38 }
 0x39a   : > { %v2284_v43 = vpop.xlane.xlu0 %947 }
 0x39b   : > { %v977_v6 = vsub.f32 %v2133_v23, %v2284_v43 }
 0x39d   : > { %v995_v45 = vmul.f32 1.442695, %v977_v6 }
 0x39e   : > { %v2288_v7 = vpop.xlane.xlu1 %949  ;;  %v2290_v49 = vpop.xlane.xlu0 %943 }
 0x39f   : > { %1730 = vpow2.f32 %v995_v45  ;;  %v978_v8 = vsub.f32 %v2145_v27, %v2288_v7  ;;  %v975_v50 = vsub.f32 %v2150_v28, %v2290_v49 }
 0x3a1   : > { %v997_v52 = vmul.f32 1.442695, %v978_v8  ;;  %v991_v10 = vmul.f32 1.442695, %v975_v50 }
 0x3a2   : > { %v2296_v55 = vpop.xlane.xlu1 %945  ;;  %v2298_v14 = vpop.xlane.xlu0 %955 }
 0x3a3   : > { %1732 = vpow2.f32 %v997_v52  ;;  %v976_v23 = vsub.f32 %v2167_v42, %v2296_v55  ;;  %v981_v15 = vsub.f32 %v2172_v1, %v2298_v14 }
 0x3a4   : > { %1734 = vpow2.f32 %v991_v10 }
 0x3a5   : > { %v993_v57 = vmul.f32 1.442695, %v976_v23  ;;  %v1003_v35 = vmul.f32 1.442695, %v981_v15 }
 0x3a6   : > { %v2304_v27 = vpop.xlane.xlu1 %957  ;;  %v2306_v40 = vpop.xlane.xlu0 %951 }
 0x3a7   : > { %1736 = vpow2.f32 %v993_v57  ;;  %v982_v28 = vsub.f32 %v2185_v47, %v2304_v27  ;;  %v979_v41 = vsub.f32 %v2190_v48, %v2306_v40 }
 0x3a8   : > { %1738 = vpow2.f32 %v1003_v35 }
 0x3a9   : > { %v1005_v58 = vmul.f32 1.442695, %v982_v28  ;;  %v999_v42 = vmul.f32 1.442695, %v979_v41 }
 0x3aa   : > { %v2312_v59 = vpop.xlane.xlu1 %953  ;;  %v2314_v1 = vpop.xlane.xlu0 %963 }
 0x3ab   : > { %1740 = vpow2.f32 %v1005_v58  ;;  %v980_v60 = vsub.f32 %v2207_v11, %v2312_v59  ;;  %v985_v5 = vsub.f32 %v2212_v54, %v2314_v1 }
 0x3ac   : > { %v1731_v9 = vpop.eup %1730  ;;  %1742 = vpow2.f32 %v999_v42 }
 0x3ad   : > { %v1001_v47 = vmul.f32 1.442695, %v980_v60  ;;  %v1011_v12 = vmul.f32 1.442695, %v985_v5  ;;  %1027 = vadd.xlane.f32.xlu0 %v1731_v9 }
 0x3ae   : > { %v2320_v48 = vpop.xlane.xlu1 %965  ;;  %v2322_v21 = vpop.xlane.xlu0 %959 }
 0x3af   : > { %1744 = vpow2.f32 %v1001_v47  ;;  %v986_v25 = vsub.f32 %v2225_v31, %v2320_v48  ;;  %v983_v29 = vsub.f32 %v2230_v34, %v2322_v21 }
 0x3b0   : > { %v1733_v11 = vpop.eup %1732  ;;  %1746 = vpow2.f32 %v1011_v12 }
 0x3b1   : > { %v1735_v32 = vpop.eup %1734  ;;  %v1013_v54 = vmul.f32 1.442695, %v986_v25  ;;  %v1007_v37 = vmul.f32 1.442695, %v983_v29  ;;  %1029 = vadd.xlane.f32.xlu1 %v1733_v11 }
 0x3b2   : > { %1023 = vadd.xlane.f32.xlu0 %v1735_v32  ;;  %v2328_v18 = vpop.xlane.xlu1 %961  ;;  %v1161_v32 = vsub.s32 3, %v2048_v63 }
 0x3b3   : > { %1748 = vpow2.f32 %v1013_v54  ;;  %v984_v38 = vsub.f32 %v2244_v3, %v2328_v18 }
 0x3b4   : > { %v1737_v6 = vpop.eup %1736  ;;  %1750 = vpow2.f32 %v1007_v37  ;;  %v2332_v45 = vpop.xlane.xlu0 %967 }
 0x3b5   : > { %v1739_v31 = vpop.eup %1738  ;;  %v1009_v8 = vmul.f32 1.442695, %v984_v38  ;;  %v987_v34 = vsub.f32 %v2256_v19, %v2332_v45  ;;  %1025 = vadd.xlane.f32.xlu1 %v1737_v6  ;;  %v2350_v38 = vrot.slane %v2054_v4, %v1161_v32 }
 0x3b6   : > { %1035 = vadd.xlane.f32.xlu0 %v1739_v31 }
 0x3b7   : > { %1752 = vpow2.f32 %v1009_v8  ;;  %v1015_v50 = vmul.f32 1.442695, %v987_v34 }
 0x3b8   : > { %v1741_v52 = vpop.eup %1740  ;;  %v2336_v10 = vpop.xlane.xlu1 %969 }
 0x3b9   : > { %v2338_v23 = vpop.xlane.xlu0 %971  ;;  %v1743_v15 = vpop.eup %1742  ;;  %1754 = vpow2.f32 %v1015_v50  ;;  %v988_v3 = vsub.f32 %v2268_v0, %v2336_v10  ;;  %1037 = vadd.xlane.f32.xlu1 %v1741_v52 }
 0x3ba   : > { %v989_v57 = vsub.f32 %v2273_v33, %v2338_v23  ;;  %1031 = vadd.xlane.f32.xlu0 %v1743_v15 }
 0x3bb   : > { %v1017_v19 = vmul.f32 1.442695, %v988_v3 }
 0x3bc   : > { %v1019_v35 = vmul.f32 1.442695, %v989_v57  ;;  %v1745_v28 = vpop.eup %1744  ;;  %v2344_v41 = vpop.xlane.xlu1 %973 }
 0x3bd   : > { %v1747_v58 = vpop.eup %1746  ;;  %1756 = vpow2.f32 %v1017_v19  ;;  %v990_v42 = vsub.f32 %v2281_v2, %v2344_v41  ;;  %1033 = vadd.xlane.f32.xlu1 %v1745_v28 }
 0x3be   : > { %1758 = vpow2.f32 %v1019_v35  ;;  %1043 = vadd.xlane.f32.xlu0 %v1747_v58 }
 0x3bf   : > { %v1021_v60 = vmul.f32 1.442695, %v990_v42 }
 0x3c0   : > { %v1749_v0 = vpop.eup %1748 }
 0x3c1   : > { %v1751_v5 = vpop.eup %1750  ;;  %1760 = vpow2.f32 %v1021_v60  ;;  %1045 = vadd.xlane.f32.xlu1 %v1749_v0 }
 0x3c2   : > { %1039 = vadd.xlane.f32.xlu0 %v1751_v5 }
 0x3c4   : > { %v1753_v33 = vpop.eup %1752 }
 0x3c5   : > { %1041 = vadd.xlane.f32.xlu1 %v1753_v33 }
 0x3c6   : > { %v1755_v9 = vpop.eup %1754 }
 0x3c7   : > { %1047 = vadd.xlane.f32.xlu0 %v1755_v9 }
 0x3ca   : > { %v1757_v47 = vpop.eup %1756 }
 0x3cb   : > { %v1759_v12 = vpop.eup %1758  ;;  %1049 = vadd.xlane.f32.xlu1 %v1757_v47 }
 0x3cc   : > { %1051 = vadd.xlane.f32.xlu0 %v1759_v12 }
 0x3ce   : > { %v1761_v25 = vpop.eup %1760 }
 0x3cf   : > { %1053 = vadd.xlane.f32.xlu1 %v1761_v25 }
 0x3db   : > { %v1636_v54 = vpop.f32.mrf.mxu0 }
 0x3dc   : > { %v1254_v34 = vadd.f32 %v1636_v54, %v2350_v38 }
 0x3dd   : > { %v1245_v6 = vpop.f32.mrf.mxu0 }
 0x3de   : > { %v1246_v3 = vadd.f32 %v1245_v6, %v2350_v38 }
 0x3df   : > { %v1637_v50 = vpop.f32.mrf.mxu0 }
 0x3e0   : > { %v1257_v63 = vadd.f32 %v1637_v50, %v2350_v38 }
 0x3e1   : > { %v1248_v4 = vpop.f32.mrf.mxu0 }
 0x3e2   : > { %v1249_v28 = vadd.f32 %v1248_v4, %v2350_v38 }
 0x3e3   : > { %v1640_v2 = vpop.f32.mrf.mxu1 }
 0x3e4   : > { %v1270_v42 = vadd.f32 %v1640_v2, %v2350_v38 }
 0x3e5   : > { %v1261_v29 = vpop.f32.mrf.mxu1 }
 0x3e6   : > { %v1262_v33 = vadd.f32 %v1261_v29, %v2350_v38 }
 0x3e7   : > { %v1641_v11 = vpop.f32.mrf.mxu1 }
 0x3e8   : > { %v1273_v12 = vadd.f32 %v1641_v11, %v2350_v38 }
 0x3e9   : > { %v1264_v37 = vpop.f32.mrf.mxu1 }
 0x3eb   : > { %v1644_v8 = vpop.f32.mrf.mxu1 }
 0x3ec   : > { %v1286_v11 = vadd.f32 %v1644_v8, %v2350_v38 }
 0x3ed   : > { %v2354_v57 = vpop.f32.mrf.mxu1 }
 0x3ef   : > { %v1645_v58 = vpop.f32.mrf.mxu1 }
 0x3f1   : > { %v1280_v9 = vpop.f32.mrf.mxu1 }
 0x436   : > { %v1028_v31 = vpop.xlane.xlu0 %1027 }
 0x437   : > { %1762 = vlog2.f32 %v1028_v31  ;;  %v1265_v31 = vadd.f32 %v1264_v37, %v2350_v38 }
 0x43a   : > { %v1030_v52 = vpop.xlane.xlu1 %1029 }
 0x43b   : > { %1764 = vlog2.f32 %v1030_v52  ;;  %v1024_v15 = vpop.xlane.xlu0 %1023 }
 0x43c   : > { %1766 = vlog2.f32 %v1024_v15 }
 0x43d   : > { %1768 = vtanh.f32 %v1254_v34  ;;  %v2363_v34 = vpop.f32.mrf.mxu1 }
 0x43e   : > { %v1026_v19 = vpop.xlane.xlu1 %1025 }
 0x43f   : > { %1770 = vlog2.f32 %v1026_v19  ;;  %v1036_v35 = vpop.xlane.xlu0 %1035 }
 0x440   : > { %1772 = vlog2.f32 %v1036_v35  ;;  %v1293_v35 = vpop.f32.mrf.mxu1 }
 0x441   : > { %1774 = vtanh.f32 %v1246_v3 }
 0x442   : > { %1776 = vtanh.f32 %v1257_v63  ;;  %v1038_v60 = vpop.xlane.xlu1 %1037 }
 0x443   : > { %1778 = vlog2.f32 %v1038_v60  ;;  %v1032_v0 = vpop.xlane.xlu0 %1031 }
 0x444   : > { %v1763_v5 = vpop.eup %1762  ;;  %1780 = vlog2.f32 %v1032_v0  ;;  %v1289_v0 = vadd.f32 %v1645_v58, %v2350_v38  ;;  %v1281_v58 = vadd.f32 %v1280_v9, %v2350_v38 }
 0x445   : > { %1782 = vtanh.f32 %v1249_v28  ;;  %v1060_v47 = vmul.f32 0.6931472, %v1763_v5 }
 0x446   : > { %1784 = vtanh.f32 %v1270_v42  ;;  %v1034_v25 = vpop.xlane.xlu1 %1033 }
 0x447   : > { %v1089_v32 = vadd.f32 %v1060_v47, %v2284_v43  ;;  %1786 = vlog2.f32 %v1034_v25  ;;  %v1044_v54 = vpop.xlane.xlu0 %1043 }
 0x448   : > { %v1765_v2 = vpop.eup %1764  ;;  %1788 = vlog2.f32 %v1044_v54 }
 0x449   : > { %v1767_v6 = vpop.eup %1766  ;;  %1790 = vtanh.f32 %v1262_v33  ;;  %v1105_v29 = vsub.f32 %v2125_v20, %v1089_v32  ;;  %v1062_v50 = vmul.f32 0.6931472, %v1765_v2 }
 0x44a   : > { %1792 = vtanh.f32 %v1273_v12  ;;  %v1056_v52 = vmul.f32 0.6931472, %v1767_v6  ;;  %v1046_v15 = vpop.xlane.xlu1 %1045  ;;  %v1769_v43 = vpop.eup %1768 }
 0x44b   : > { %v1121_v37 = vsel %vm926_vm1, %v1105_v29, 0.0  ;;  %v1090_v3 = vadd.f32 %v1062_v50, %v2288_v7  ;;  %1794 = vlog2.f32 %v1046_v15  ;;  %v1040_v20 = vpop.xlane.xlu0 %1039 }
 0x44c   : > { %v1771_v63 = vpop.eup %1770  ;;  %v1326_v4 = vadd.f32 %v1769_v43, %v1121_v37  ;;  %v1087_v8 = vadd.f32 %v1056_v52, %v2290_v49  ;;  %1796 = vlog2.f32 %v1040_v20  ;;  %v1278_v49 = vadd.f32 %v2354_v57, %v2350_v38  ;;  %v1649_v57 = vpop.f32.mrf.mxu1 }
 0x44d   : > { %v1773_v19 = vpop.eup %1772  ;;  %1798 = vtanh.f32 %v1265_v31  ;;  %v1106_v28 = vsub.f32 %v2137_v24, %v1090_v3  ;;  %v1058_v42 = vmul.f32 0.6931472, %v1771_v63 }
 0x44e   : > { %v1775_v60 = vpop.eup %1774  ;;  %1800 = vtanh.f32 %v1286_v11  ;;  %1342 = vst.msk [vmem:[%s2372_s30 + $0x10] sm:$0xff] %vm284_vm0, %v1326_v4  ;;  %v1103_v7 = vsub.f32 %v2128_v22, %v1087_v8  ;;  %v1068_v5 = vmul.f32 0.6931472, %v1773_v19  ;;  %v1042_v33 = vpop.xlane.xlu1 %1041 }
 0x44f   : > { %v1777_v47 = vpop.eup %1776  ;;  %v1122_v12 = vsel %vm926_vm1, %v1106_v28, 0.0  ;;  %v1088_v24 = vadd.f32 %v1058_v42, %v2296_v55  ;;  %1802 = vlog2.f32 %v1042_v33  ;;  %v1296_v4 = vpop.f32.mrf.mxu1 }
 0x450   : > { %v1779_v25 = vpop.eup %1778  ;;  %v1327_v32 = vadd.f32 %v1777_v47, %v1122_v12  ;;  %v1119_v22 = vsel %vm926_vm1, %v1103_v7, 0.0  ;;  %v1093_v54 = vadd.f32 %v1068_v5, %v2298_v14  ;;  %v1048_v2 = vpop.xlane.xlu0 %1047  ;;  %v1294_v14 = vadd.f32 %v1293_v35, %v2350_v38 }
 0x451   : > { %v1781_v6 = vpop.eup %1780  ;;  %v1324_v31 = vadd.f32 %v1775_v60, %v1119_v22  ;;  %v1104_v29 = vsub.f32 %v2140_v26, %v1088_v24  ;;  %v1070_v50 = vmul.f32 0.6931472, %v1779_v25  ;;  %1804 = vlog2.f32 %v1048_v2 }
 0x452   : > { %v1783_v55 = vpop.eup %1782  ;;  %1806 = vtanh.f32 %v1289_v0  ;;  %1343 = vst.msk [vmem:[%s2372_s30 + $0x18] sm:$0xff] %vm284_vm0, %v1327_v32  ;;  %v1109_v9 = vsub.f32 %v2158_v36, %v1093_v54  ;;  %v1064_v11 = vmul.f32 0.6931472, %v1781_v6  ;;  %v1297_v33 = vadd.f32 %v1296_v4, %v2350_v38 }
 0x453   : > { %v1785_v52 = vpop.eup %1784  ;;  %1808 = vtanh.f32 %v1278_v49  ;;  %1340 = vst.msk [vmem:[%s2372_s30] sm:$0xff] %vm284_vm0, %v1324_v31  ;;  %v1120_v15 = vsel %vm926_vm1, %v1104_v29, 0.0  ;;  %v1094_v26 = vadd.f32 %v1070_v50, %v2304_v27  ;;  %v1305_v2 = vadd.f32 %v1649_v57, %v2350_v38 }
 0x454   : > { %v1787_v43 = vpop.eup %1786  ;;  %1810 = vtanh.f32 %v1281_v58  ;;  %v1325_v37 = vadd.f32 %v1783_v55, %v1120_v15  ;;  %v1125_v3 = vsel %vm926_vm1, %v1109_v9, 0.0  ;;  %v1091_v36 = vadd.f32 %v1064_v11, %v2306_v40  ;;  %v1050_v20 = vpop.xlane.xlu1 %1049 }
 0x455   : > { %v1789_v63 = vpop.eup %1788  ;;  %v1330_v8 = vadd.f32 %v1785_v52, %v1125_v3  ;;  %v1110_v19 = vsub.f32 %v2177_v44, %v1094_v26  ;;  %v1066_v35 = vmul.f32 0.6931472, %v1787_v43  ;;  %1812 = vlog2.f32 %v1050_v20  ;;  %v1052_v28 = vpop.xlane.xlu0 %1051 }
 0x456   : > { %v1791_v42 = vpop.eup %1790  ;;  %1341 = vst.msk [vmem:[%s2372_s30 + $0x8] sm:$0xff] %vm284_vm0, %v1325_v37  ;;  %v1107_v27 = vsub.f32 %v2162_v39, %v1091_v36  ;;  %v1076_v60 = vmul.f32 0.6931472, %v1789_v63  ;;  %1814 = vlog2.f32 %v1052_v28  ;;  %v1302_v40 = vadd.f32 %v2363_v34, %v2350_v38 }
 0x457   : > { %v1793_v0 = vpop.eup %1792  ;;  %1816 = vtanh.f32 %v1294_v14  ;;  %1346 = vst.msk [vmem:[%s2372_s30 + $0x30] sm:$0xff] %vm284_vm0, %v1330_v8  ;;  %v1126_v44 = vsel %vm926_vm1, %v1110_v19, 0.0  ;;  %v1092_v7 = vadd.f32 %v1066_v35, %v2312_v59 }
 0x458   : > { %v1795_v5 = vpop.eup %1794  ;;  %v1331_v39 = vadd.f32 %v1793_v0, %v1126_v44  ;;  %v1123_v47 = vsel %vm926_vm1, %v1107_v27, 0.0  ;;  %v1097_v49 = vadd.f32 %v1076_v60, %v2314_v1  ;;  %v1054_v34 = vpop.xlane.xlu1 %1053 }
 0x459   : > { %v1797_v12 = vpop.eup %1796  ;;  %v1328_v24 = vadd.f32 %v1791_v42, %v1123_v47  ;;  %v1108_v25 = vsub.f32 %v2180_v46, %v1092_v7  ;;  %v1078_v58 = vmul.f32 0.6931472, %v1795_v5  ;;  %1818 = vlog2.f32 %v1054_v34 }
 0x45a   : > { %v1799_v32 = vpop.eup %1798  ;;  %1347 = vst.msk [vmem:[%s2372_s30 + $0x38] sm:$0xff] %vm284_vm0, %v1331_v39  ;;  %v1113_v59 = vsub.f32 %v2198_v51, %v1097_v49  ;;  %v1072_v22 = vmul.f32 0.6931472, %v1797_v12  ;;  %1820 = vtanh.f32 %v1297_v33 }
 0x45b   : > { %v1801_v54 = vpop.eup %1800  ;;  %1344 = vst.msk [vmem:[%s2372_s30 + $0x20] sm:$0xff] %vm284_vm0, %v1328_v24  ;;  %v1124_v1 = vsel %vm926_vm1, %v1108_v25, 0.0  ;;  %v1098_v46 = vadd.f32 %v1078_v58, %v2320_v48  ;;  %1822 = vtanh.f32 %v1302_v40 }
 0x45c   : > { %v1803_v6 = vpop.eup %1802  ;;  %v1329_v31 = vadd.f32 %v1799_v32, %v1124_v1  ;;  %v1129_v29 = vsel %vm926_vm1, %v1113_v59, 0.0  ;;  %v1095_v51 = vadd.f32 %v1072_v22, %v2322_v21  ;;  %1824 = vtanh.f32 %v1305_v2 }
 0x45d   : > { %v1334_v50 = vadd.f32 %v1801_v54, %v1129_v29  ;;  %v1114_v38 = vsub.f32 %v2217_v56, %v1098_v46  ;;  %v1074_v57 = vmul.f32 0.6931472, %v1803_v6 }
 0x45e   : > { %v1805_v55 = vpop.eup %1804  ;;  %1345 = vst.msk [vmem:[%s2372_s30 + $0x28] sm:$0xff] %vm284_vm0, %v1329_v31  ;;  %v1111_v9 = vsub.f32 %v2202_v53, %v1095_v51 }
 0x45f   : > { %v1807_v48 = vpop.eup %1806  ;;  %1350 = vst.msk [vmem:[%s2372_s30 + $0x50] sm:$0xff] %vm284_vm0, %v1334_v50  ;;  %v1130_v11 = vsel %vm926_vm1, %v1114_v38, 0.0  ;;  %v1096_v21 = vadd.f32 %v1074_v57, %v2328_v18  ;;  %v1080_v52 = vmul.f32 0.6931472, %v1805_v55 }
 0x460   : > { %v1809_v14 = vpop.eup %1808  ;;  %v1335_v56 = vadd.f32 %v1807_v48, %v1130_v11  ;;  %v1127_v15 = vsel %vm926_vm1, %v1111_v9, 0.0 }
 0x461   : > { %v1811_v26 = vpop.eup %1810  ;;  %v1332_v43 = vadd.f32 %v1809_v14, %v1127_v15  ;;  %v1112_v53 = vsub.f32 %v2220_v30, %v1096_v21  ;;  %v1099_v37 = vadd.f32 %v1080_v52, %v2332_v45 }
 0x462   : > { %v1813_v3 = vpop.eup %1812  ;;  %1351 = vst.msk [vmem:[%s2372_s30 + $0x58] sm:$0xff] %vm284_vm0, %v1335_v56 }
 0x463   : > { %v1815_v36 = vpop.eup %1814  ;;  %1348 = vst.msk [vmem:[%s2372_s30 + $0x40] sm:$0xff] %vm284_vm0, %v1332_v43  ;;  %v1128_v18 = vsel %vm926_vm1, %v1112_v53, 0.0  ;;  %v1115_v20 = vsub.f32 %v2239_v61, %v1099_v37  ;;  %v1082_v63 = vmul.f32 0.6931472, %v1813_v3 }
 0x464   : > { %v1817_v4 = vpop.eup %1816  ;;  %v1333_v8 = vadd.f32 %v1811_v26, %v1128_v18  ;;  %v1084_v19 = vmul.f32 0.6931472, %v1815_v36 }
 0x465   : > { %v1131_v30 = vsel %vm926_vm1, %v1115_v20, 0.0  ;;  %v1100_v45 = vadd.f32 %v1082_v63, %v2336_v10 }
 0x466   : > { %v1819_v35 = vpop.eup %1818  ;;  %1349 = vst.msk [vmem:[%s2372_s30 + $0x48] sm:$0xff] %vm284_vm0, %v1333_v8  ;;  %v1336_v28 = vadd.f32 %v1817_v4, %v1131_v30  ;;  %v1101_v42 = vadd.f32 %v1084_v19, %v2338_v23 }
 0x467   : > { %v1116_v27 = vsub.f32 %v2260_v62, %v1100_v45  ;;  %v1086_v61 = vmul.f32 0.6931472, %v1819_v35  ;;  %v1821_v0 = vpop.eup %1820 }
 0x468   : > { %1352 = vst.msk [vmem:[%s2372_s30 + $0x60] sm:$0xff] %vm284_vm0, %v1336_v28  ;;  %v1117_v60 = vsub.f32 %v2248_v13, %v1101_v42  ;;  %v1823_v44 = vpop.eup %1822 }
 0x469   : > { %v1132_v10 = vsel %vm926_vm1, %v1116_v27, 0.0  ;;  %v1102_v40 = vadd.f32 %v1086_v61, %v2344_v41  ;;  %v1825_v33 = vpop.eup %1824 }
 0x46a   : > { %v1337_v7 = vadd.f32 %v1821_v0, %v1132_v10  ;;  %v1133_v5 = vsel %vm926_vm1, %v1117_v60, 0.0 }
 0x46b   : > { %v1338_v23 = vadd.f32 %v1823_v44, %v1133_v5  ;;  %v1118_v62 = vsub.f32 %v2251_v16, %v1102_v40 }
 0x46c   : > { %1353 = vst.msk [vmem:[%s2372_s30 + $0x68] sm:$0xff] %vm284_vm0, %v1337_v7 }
 0x46d   : > { %1354 = vst.msk [vmem:[%s2372_s30 + $0x70] sm:$0xff] %vm284_vm0, %v1338_v23  ;;  %v1134_v13 = vsel %vm926_vm1, %v1118_v62, 0.0 }
 0x46e   : > { %v1339_v39 = vadd.f32 %v1825_v33, %v1134_v13 }
 0x470   : > { %1355 = vst.msk [vmem:[%s2372_s30 + $0x78] sm:$0xff] %vm284_vm0, %v1339_v39 }
 0x471 PF: > { %s14_s15 = sadd.s32 1, %s1832_s15  }
 0x472   : > { %p11_p4 = scmp.ge.s32.totalorder %s14_s15, 4  }
 0x474   :  { %13 = sbr.rel (!%p11_p4) target bundleno = 1 (0x1), region = 66 }

</bundles_post_ra>
